<compile_context>
chip_gen: v6e
topology: v6e:2x2x1
jax: 0.10.0
libtpu: 0.0.40
codegen_flags: <defaults>
</compile_context>

<pallas_src>
import jax
import jax.numpy as jnp
from jax.experimental import pallas as pl
from jax.experimental.pallas import tpu as pltpu


def _round_up(x, m):
    return (x + m - 1) // m * m


def _mlp_kernel(x_ref, w1_ref, t1_ref, w2_ref, t2_ref, o_ref):
    # x_ref : [TB, Fp]  (input dtype)      w1_ref: [Fp, Hp]  (MXU dtype, BN-scaled)
    # t1_ref: [1, Hp]   (f32 shift)        w2_ref: [Hp, Hp]  (MXU dtype, BN-scaled)
    # t2_ref: [1, Hp]   (f32 shift)        o_ref : [TB, Hp]  (out dtype)
    # In-kernel cast to the MXU operand dtype (cheap VPU work hidden under the
    # matmul) — avoids a wrapper-side pad/cast HBM round trip of x.
    x = x_ref[...].astype(w1_ref.dtype)

    # fc1 (+ folded bias/BN shift) + relu   (dropout2d == identity in eval)
    h = jnp.dot(x, w1_ref[...], preferred_element_type=jnp.float32)
    h = jnp.maximum(h + t1_ref[...], 0.0)

    # fc2 (+ folded bias/BN shift) + relu
    h = h.astype(w2_ref.dtype)
    o = jnp.dot(h, w2_ref[...], preferred_element_type=jnp.float32)
    o = jnp.maximum(o + t2_ref[...], 0.0)
    o_ref[...] = o.astype(o_ref.dtype)


def _vmem_limit_bytes():
    """Per-generation scoped VMEM limit (85% of capacity, clamped)."""
    try:
        cap = int(pltpu.get_tpu_info().vmem_capacity_bytes)
    except Exception:
        cap = 64 * 1024 * 1024        # conservative fallback (v7x per-TC size)
    limit = int(cap * 0.85)
    return max(32 * 1024 * 1024, min(limit, 110 * 1024 * 1024))


def feature_extractor_mlp(x, params, *, mxu_dtype=jnp.bfloat16, out_dtype=None,
                          block_b_max=2048):
    """Fused forward pass.  x: [B, featureSize]."""
    (w1, b1, g1, beta1, rm1, rv1,
     w2, b2, g2, beta2, rm2, rv2) = params
    eps = 1e-5
    if out_dtype is None:
        out_dtype = jnp.float32

    # Fold eval-mode BatchNorm + Linear bias:
    #   y = (x@W + b - rm)/sqrt(rv+eps)*g + beta = x @ (W*s) + t
    s1 = g1 / jnp.sqrt(rv1 + eps)
    t1 = (b1 - rm1) * s1 + beta1
    s2 = g2 / jnp.sqrt(rv2 + eps)
    t2 = (b2 - rm2) * s2 + beta2
    w1s = w1 * s1[None, :]          # BN scale folded into weights (one-time prep)
    w2s = w2 * s2[None, :]

    B, F = x.shape
    H = w1.shape[1]

    vmem_limit = _vmem_limit_bytes()
    op_bytes = jnp.dtype(mxu_dtype).itemsize

    # Large-H guard: fully resident f32 weights (w1: Fp*Hp, w2: Hp*Hp) must fit
    # comfortably under the VMEM limit on every generation (v7x is 64 MiB/TC).
    Fp_est, Hp_est = _round_up(F, 128), _round_up(H, 128)
    if op_bytes == 4 and (Fp_est * Hp_est + Hp_est * Hp_est) * 4 > vmem_limit // 2:
        # TODO(synk): N/K-tiled second matmul instead of forcing bf16 weights.
        mxu_dtype = jnp.bfloat16
        op_bytes = 2

    # Lane-dense padding: 256-aligned K/N for bf16 (2x256^2 MXU on v6e/v7x),
    # 128-aligned for f32.
    lane_mult = 256 if op_bytes <= 2 else 128
    Fp = _round_up(F, lane_mult)
    Hp = _round_up(H, lane_mult)

    x_bytes = jnp.dtype(x.dtype).itemsize
    out_bytes = jnp.dtype(out_dtype).itemsize

    # ---- Size the batch tile TB from an explicit VMEM budget. ----
    # Residents are single-buffered (Buffered(1)); streams are double/triple
    # buffered; the f32 intermediate h and its mxu-dtype copy live per tile.
    weight_vmem = (Fp * Hp + Hp * Hp) * op_bytes + 2 * Hp * 4
    budget = vmem_limit - weight_vmem - (4 << 20)     # compiler-scratch headroom
    per_row = (3 * Fp * x_bytes                       # x stream (<=3 buffers)
               + 2 * Hp * out_bytes                   # out stream (2 buffers)
               + Hp * 4 + Hp * op_bytes)              # f32 h + mxu-dtype copy
    tb_cap = max(budget, 0) // per_row
    tb_cap = max(int(tb_cap), 16)

    B8 = _round_up(B, 8)
    tb = min(block_b_max, tb_cap)
    tb = max(16, (tb // 16) * 16)                     # sublane-packed (bf16) tile
    if tb >= B8:
        TB, Bp = B8, B8                               # single tile == full batch
    else:
        TB = tb
        Bp = _round_up(B8, TB)
    grid_steps = Bp // TB

    # ---- Prepare operands (weights/shifts are tiny one-time prep). ----
    if (Bp != B) or (Fp != F):
        xp = jnp.pad(x, ((0, Bp - B), (0, Fp - F)))
    else:
        xp = x                                        # no extra HBM round trip
    w1p = jnp.pad(w1s, ((0, Fp - F), (0, Hp - H))).astype(mxu_dtype)
    w2p = jnp.pad(w2s, ((0, Hp - H), (0, Hp - H))).astype(mxu_dtype)
    # Post-matmul VPU math stays in f32 (v5e has no bf16 VPU path).
    t1p = jnp.pad(t1, (0, Hp - H)).reshape(1, Hp).astype(jnp.float32)
    t2p = jnp.pad(t2, (0, Hp - H)).reshape(1, Hp).astype(jnp.float32)

    # ---- Specs ----
    # Streamed x: triple-buffer in the mem-bound small-H multi-tile regime.
    if Hp <= 256 and grid_steps >= 3:
        x_spec = pl.BlockSpec((TB, Fp), lambda i: (i, 0),
                              pipeline_mode=pl.Buffered(3))
    else:
        x_spec = pl.BlockSpec((TB, Fp), lambda i: (i, 0))

    def _resident(shape):
        # Constant index_map -> never re-DMA'd; single buffer halves residency.
        return pl.BlockSpec(shape, lambda i: (0, 0), pipeline_mode=pl.Buffered(1))

    cost = pl.CostEstimate(
        flops=2 * Bp * (Fp * Hp + Hp * Hp),
        transcendentals=0,
        bytes_accessed=Bp * Fp * x_bytes
        + (Fp * Hp + Hp * Hp) * op_bytes
        + 2 * Hp * 4
        + Bp * Hp * out_bytes,
    )

    out = pl.pallas_call(
        _mlp_kernel,
        out_shape=jax.ShapeDtypeStruct((Bp, Hp), out_dtype),
        grid=(grid_steps,),
        in_specs=[
            x_spec,                      # x: streamed over batch
            _resident((Fp, Hp)),         # w1: VMEM-resident, single-buffered
            _resident((1, Hp)),          # t1
            _resident((Hp, Hp)),         # w2
            _resident((1, Hp)),          # t2
        ],
        out_specs=pl.BlockSpec((TB, Hp), lambda i: (i, 0)),
        compiler_params=pltpu.CompilerParams(
            dimension_semantics=("parallel",),   # megacore-shard batch
            vmem_limit_bytes=vmem_limit,
        ),
        cost_estimate=cost,
    )(xp, w1p, t1p, w2p, t2p)

    return out[:B, :H]


def init_params(key, feature_size, out_feature_size):
    """Deterministic parameter init mirroring the PyTorch module's shapes.
    Linear weights are stored as [in, out] (transposed vs. PyTorch [out, in])."""
    k1, k2, k3, k4 = jax.random.split(key, 4)
    lim1 = 1.0 / jnp.sqrt(feature_size)
    lim2 = 1.0 / jnp.sqrt(out_feature_size)
    w1 = jax.random.uniform(k1, (feature_size, out_feature_size),
                            jnp.float32, -lim1, lim1)
    b1 = jax.random.uniform(k2, (out_feature_size,), jnp.float32, -lim1, lim1)
    w2 = jax.random.uniform(k3, (out_feature_size, out_feature_size),
                            jnp.float32, -lim2, lim2)
    b2 = jax.random.uniform(k4, (out_feature_size,), jnp.float32, -lim2, lim2)
    # BatchNorm1d defaults: gamma=1, beta=0, running_mean=0, running_var=1
    g1 = jnp.ones((out_feature_size,), jnp.float32)
    beta1 = jnp.zeros((out_feature_size,), jnp.float32)
    rm1 = jnp.zeros((out_feature_size,), jnp.float32)
    rv1 = jnp.ones((out_feature_size,), jnp.float32)
    g2 = jnp.ones((out_feature_size,), jnp.float32)
    beta2 = jnp.zeros((out_feature_size,), jnp.float32)
    rm2 = jnp.zeros((out_feature_size,), jnp.float32)
    rv2 = jnp.ones((out_feature_size,), jnp.float32)
    return (w1, b1, g1, beta1, rm1, rv1,
            w2, b2, g2, beta2, rm2, rv2)


def _reference(x, params):
    eps = 1e-5
    (w1, b1, g1, beta1, rm1, rv1, w2, b2, g2, beta2, rm2, rv2) = params
    h = x @ w1 + b1
    h = (h - rm1) / jnp.sqrt(rv1 + eps) * g1 + beta1
    h = jnp.maximum(h, 0.0)
    r = h @ w2 + b2
    r = (r - rm2) / jnp.sqrt(rv2 + eps) * g2 + beta2
    return jnp.maximum(r, 0.0)


if __name__ == "__main__":
    key = jax.random.PRNGKey(0)
    kx, kx2, kp = jax.random.split(key, 3)

    batch = 8
    feature_size = 16
    out_feature_size = 32

    x = jax.random.normal(kx, (batch, feature_size), jnp.float32)
    params = init_params(kp, feature_size, out_feature_size)
    ref = _reference(x, params)

    # f32 MXU operands: tight tolerance.
    out_f32 = feature_extractor_mlp(x, params, mxu_dtype=jnp.float32)
    jax.block_until_ready(out_f32)
    assert out_f32.shape == (batch, out_feature_size)
    assert jnp.allclose(out_f32, ref, atol=1e-5, rtol=1e-5)

    # Default path: bf16 MXU operands (fast on v5e/v6e/v7x), f32 accumulation.
    out_bf = feature_extractor_mlp(x, params)
    jax.block_until_ready(out_bf)
    assert jnp.allclose(out_bf, ref, atol=5e-2, rtol=5e-2)

    # bf16 output writeback (halves the output HBM stream).
    out_bf16o = feature_extractor_mlp(x, params, out_dtype=jnp.bfloat16)
    jax.block_until_ready(out_bf16o)
    assert out_bf16o.dtype == jnp.bfloat16
    assert jnp.allclose(out_bf16o.astype(jnp.float32), ref, atol=5e-2, rtol=5e-2)

    # Multi-tile batch (grid > 1): exercises the streamed (triple-buffered) x
    # path with single-buffered resident weights.
    x2 = jax.random.normal(kx2, (64, feature_size), jnp.float32)
    out2 = feature_extractor_mlp(x2, params, mxu_dtype=jnp.float32,
                                 block_b_max=16)
    jax.block_until_ready(out2)
    assert jnp.allclose(out2, _reference(x2, params), atol=1e-5, rtol=1e-5)

    print("KERNEL_OK")
</pallas_src>

<mosaic_0001>
module attributes {stable_mosaic.version = 11 : i64} {
  func.func @_mlp_kernel(%arg0: i32, %arg1: memref<8x128xf32, #tpu.memory_space<vmem>>, %arg2: memref<128x128xf32, #tpu.memory_space<vmem>>, %arg3: memref<1x128xf32, #tpu.memory_space<vmem>>, %arg4: memref<128x128xf32, #tpu.memory_space<vmem>>, %arg5: memref<1x128xf32, #tpu.memory_space<vmem>>, %arg6: memref<8x128xf32, #tpu.memory_space<vmem>>) attributes {dimension_semantics = [#tpu.dimension_semantics<parallel>], iteration_bounds = array<i64: 1>, scalar_prefetch = 0 : i64, scratch_operands = 0 : i64, tpu.core_type = #tpu.core_type<tc>, window_params = [{transform_indices = @transform_0, window_bounds = array<i64: 8, 128>}, {pipeline_mode = #tpu.pipeline_mode<synchronous>, transform_indices = @transform_1, window_bounds = array<i64: 128, 128>}, {pipeline_mode = #tpu.pipeline_mode<synchronous>, transform_indices = @transform_2, window_bounds = array<i64: 1, 128>}, {pipeline_mode = #tpu.pipeline_mode<synchronous>, transform_indices = @transform_3, window_bounds = array<i64: 128, 128>}, {pipeline_mode = #tpu.pipeline_mode<synchronous>, transform_indices = @transform_4, window_bounds = array<i64: 1, 128>}, {transform_indices = @transform_5, window_bounds = array<i64: 8, 128>}]} {
    %c0 = arith.constant 0 : index
    %c0_0 = arith.constant 0 : index
    %0 = vector.load %arg1[%c0, %c0_0] : memref<8x128xf32, #tpu.memory_space<vmem>>, vector<8x128xf32>
    %c0_1 = arith.constant 0 : index
    %c0_2 = arith.constant 0 : index
    %1 = vector.load %arg2[%c0_1, %c0_2] : memref<128x128xf32, #tpu.memory_space<vmem>>, vector<128x128xf32>
    %cst = arith.constant dense<0.000000e+00> : vector<8x128xf32>
    %2 = tpu.matmul %0, %1, %cst {dimension_numbers = #tpu.dot_dimension_numbers<[1], [0], [0], [1], [0, 0, 1, 1], [], []>} : vector<8x128xf32>, vector<128x128xf32>, vector<8x128xf32> -> vector<8x128xf32>
    %c0_3 = arith.constant 0 : index
    %c0_4 = arith.constant 0 : index
    %3 = vector.load %arg3[%c0_3, %c0_4] : memref<1x128xf32, #tpu.memory_space<vmem>>, vector<1x128xf32>
    %4 = vector.broadcast %3 : vector<1x128xf32> to vector<8x128xf32>
    %5 = arith.addf %2, %4 : vector<8x128xf32>
    %cst_5 = arith.constant 0.000000e+00 : f32
    %6 = vector.broadcast %cst_5 : f32 to vector<8x128xf32>
    %7 = arith.maximumf %5, %6 : vector<8x128xf32>
    %c0_6 = arith.constant 0 : index
    %c0_7 = arith.constant 0 : index
    %8 = vector.load %arg4[%c0_6, %c0_7] : memref<128x128xf32, #tpu.memory_space<vmem>>, vector<128x128xf32>
    %cst_8 = arith.constant dense<0.000000e+00> : vector<8x128xf32>
    %9 = tpu.matmul %7, %8, %cst_8 {dimension_numbers = #tpu.dot_dimension_numbers<[1], [0], [0], [1], [0, 0, 1, 1], [], []>} : vector<8x128xf32>, vector<128x128xf32>, vector<8x128xf32> -> vector<8x128xf32>
    %c0_9 = arith.constant 0 : index
    %c0_10 = arith.constant 0 : index
    %10 = vector.load %arg5[%c0_9, %c0_10] : memref<1x128xf32, #tpu.memory_space<vmem>>, vector<1x128xf32>
    %11 = vector.broadcast %10 : vector<1x128xf32> to vector<8x128xf32>
    %12 = arith.addf %9, %11 : vector<8x128xf32>
    %cst_11 = arith.constant 0.000000e+00 : f32
    %13 = vector.broadcast %cst_11 : f32 to vector<8x128xf32>
    %14 = arith.maximumf %12, %13 : vector<8x128xf32>
    %c0_12 = arith.constant 0 : index
    %c0_13 = arith.constant 0 : index
    %15 = vector.load %arg6[%c0_12, %c0_13] : memref<8x128xf32, #tpu.memory_space<vmem>>, vector<8x128xf32>
    tpu.vector_store %arg6[%c0_12, %c0_13], %14 {strides = array<i32>} : memref<8x128xf32, #tpu.memory_space<vmem>>, vector<8x128xf32>,
    return
  }
  func.func @transform_0(%arg0: i32) -> (i32, i32) {
    %c0_i32 = arith.constant 0 : i32
    %c0_i32_0 = arith.constant 0 : i32
    return %arg0, %c0_i32 : i32, i32
  }
  func.func @transform_1(%arg0: i32) -> (i32, i32) {
    %c0_i32 = arith.constant 0 : i32
    %c0_i32_0 = arith.constant 0 : i32
    %c0_i32_1 = arith.constant 0 : i32
    return %c0_i32, %c0_i32_0 : i32, i32
  }
  func.func @transform_2(%arg0: i32) -> (i32, i32) {
    %c0_i32 = arith.constant 0 : i32
    %c0_i32_0 = arith.constant 0 : i32
    %c0_i32_1 = arith.constant 0 : i32
    return %c0_i32, %c0_i32_0 : i32, i32
  }
  func.func @transform_3(%arg0: i32) -> (i32, i32) {
    %c0_i32 = arith.constant 0 : i32
    %c0_i32_0 = arith.constant 0 : i32
    %c0_i32_1 = arith.constant 0 : i32
    return %c0_i32, %c0_i32_0 : i32, i32
  }
  func.func @transform_4(%arg0: i32) -> (i32, i32) {
    %c0_i32 = arith.constant 0 : i32
    %c0_i32_0 = arith.constant 0 : i32
    %c0_i32_1 = arith.constant 0 : i32
    return %c0_i32, %c0_i32_0 : i32, i32
  }
  func.func @transform_5(%arg0: i32) -> (i32, i32) {
    %c0_i32 = arith.constant 0 : i32
    %c0_i32_0 = arith.constant 0 : i32
    return %arg0, %c0_i32 : i32, i32
  }
}

</mosaic_0001>

<bundles_post_ra>
// kernel: tpu_custom_call.1
= control target key start
LH: loop header
LB: loop body
LE: loop exit
PB: predicated region body
PF: predicated region fallthrough
CT: control target
= control target key end

     0   :  { %10 = vsyncpa [#allocation3], 0  ;;  %s556_s0 = inlined_call_operand.hbm [shape: f32[8,128], index: 0, kind: input, shape index: {}]   ;;  %s557_s1 = inlined_call_operand.hbm [shape: f32[128,128], index: 1, kind: input, shape index: {}]   ;;  %s558_s2 = inlined_call_operand.vmem [shape: f32[1,128], index: 2, kind: input, shape index: {}]   ;;  %s559_s3 = inlined_call_operand.hbm [shape: f32[128,128], index: 3, kind: input, shape index: {}]   ;;  %s560_s4 = inlined_call_operand.vmem [shape: f32[1,128], index: 4, kind: input, shape index: {}]   ;;  %s561_s5 = inlined_call_operand.hbm [shape: f32[8,128], index: 5, kind: output, shape index: {}]  }
   0x1   :  { %11 = vsyncpa [#allocation6], 0 }
   0x2   :  { %12 = vsyncpa [#allocation4], 0  ;;  %s466_s18 = smov [#allocation5]  }
   0x3   :  { %s28_s19 = sshll.u32 %s466_s18, 4  ;;  %s29_s19 = int_to_ptr.vmem [resolvable:$true] %s28_s19 }
   0x4   :  { %s388_s20 = scalar_lea.vmem %s29_s19, 2048  ;;  %p393_p1 = scmp.lt.s32.totalorder %s29_s19, %s29_s19 }
   0x5   :  { %p389_p0 = scmp.ne.s32.totalorder %s29_s19, %s388_s20  ;;  %p394_p2 = scmp.lt.s32.totalorder %s388_s20, %s388_s20 }
   0x7   :  { %p395_p3 = por %p394_p2, %p393_p1 }
   0x9   :  { %p396_p4 = pnand %p395_p3, %p389_p0 }
   0xb   :  { %399 = shalt.err (!%p396_p4)
}
   0xc   :  { %s467_s21 = smov 128   ;;  %s468_s22 = smov 8  }
   0xd   :  { %34 = dma.hbm_to_vmem [thread:$0]  %s557_s1, 2048, %s29_s19, [#allocation6], %s467_s21, %s467_s21, %s468_s22  }
   0xe   :  { %s469_s25 = smov [#allocation2]   ;;  %s470_s27 = smov [#allocation7]  }
   0xf   :  { %s19_s26 = sshll.u32 %s469_s25, 4  ;;  %s42_s28 = sshll.u32 %s470_s27, 4  ;;  %s20_s26 = int_to_ptr.vmem [resolvable:$true] %s19_s26  ;;  %s43_s28 = int_to_ptr.vmem [resolvable:$true] %s42_s28 }
  0x10   :  { %s408_s29 = scalar_lea.vmem %s20_s26, 128  ;;  %p413_p6 = scmp.lt.s32.totalorder %s20_s26, %s20_s26 }
  0x11   :  { %p409_p5 = scmp.ne.s32.totalorder %s20_s26, %s408_s29  ;;  %p414_p7 = scmp.lt.s32.totalorder %s408_s29, %s408_s29 }
  0x13   :  { %p415_p8 = por %p414_p7, %p413_p6 }
  0x15   :  { %p416_p9 = pnand %p415_p8, %p409_p5 }
  0x17   :  { %419 = shalt.err (!%p416_p9)
}
  0x18   :  { %22 = dma.hbm_to_vmem [thread:$0]  %s556_s0, 128, %s20_s26, [#allocation3]  }
  0x19   :  { %s428_s7 = scalar_lea.vmem %s43_s28, 2048  ;;  %p433_p11 = scmp.lt.s32.totalorder %s43_s28, %s43_s28 }
  0x1a   :  { %p429_p10 = scmp.ne.s32.totalorder %s43_s28, %s428_s7  ;;  %p434_p12 = scmp.lt.s32.totalorder %s428_s7, %s428_s7 }
  0x1c   :  { %p435_p13 = por %p434_p12, %p433_p11 }
  0x1e   :  { %p436_p0 = pnand %p435_p13, %p429_p10 }
  0x20   :  { %439 = shalt.err (!%p436_p0)
}
  0x21   :  { %48 = dma.hbm_to_vmem [thread:$0]  %s559_s3, 2048, %s43_s28, [#allocation6], %s467_s21, %s467_s21, %s468_s22  }
  0x22   :  { %460 = dma.done.wait [#allocation3], 128  }
  0x23   :  { %461 = vsyncadd [#allocation3], 4294967168 }
  0x24   :  { %462 = dma.done.wait [#allocation6], 4096  }
  0x25   :  { %463 = vsyncadd [#allocation6], 4294963200  ;;  %v471_v0 = vmov 0.0   ;;  %vm472_vm0 = vmmov 0   ;;  %v76_v1 = vld [vmem:[#allocation5 + $0x78] sm:$0xff]  ;;  %v75_v2 = vld [vmem:[#allocation5 + $0x70] sm:$0xff] }
  0x26   :  { %302 = vmatprep.subr.mxu0 %v471_v0  ;;  %334 = vmatprep.mubr.msk.f32.mxu0 %vm472_vm0, %v471_v0  ;;  %v74_v3 = vld [vmem:[#allocation5 + $0x68] sm:$0xff]  ;;  %v73_v4 = vld [vmem:[#allocation5 + $0x60] sm:$0xff]  ;;  %v170_v5 = vld [vmem:[#allocation7 + $0x78] sm:$0xff]  ;;  %s473_s11 = smov [#allocation8]  }
  0x27   :  { %337 = vmatprep.subr.mxu1 %v471_v0  ;;  %369 = vmatprep.mubr.msk.f32.mxu1 %vm472_vm0, %v471_v0  ;;  %v72_v6 = vld [vmem:[#allocation5 + $0x58] sm:$0xff]  ;;  %v169_v7 = vld [vmem:[#allocation7 + $0x70] sm:$0xff]  ;;  %v168_v8 = vld [vmem:[#allocation7 + $0x68] sm:$0xff]  ;;  %s256_s12 = sshll.u32 %s473_s11, 4  ;;  %s257_s12 = int_to_ptr.vmem [resolvable:$true] %s256_s12 }
  0x28   :  { %303 = vmatpush3.msra.mxu0 %v76_v1  ;;  %338 = vmatpush3.msra.mxu1 %v170_v5  ;;  %v71_v9 = vld [vmem:[#allocation5 + $0x50] sm:$0xff]  ;;  %v167_v10 = vld [vmem:[#allocation7 + $0x60] sm:$0xff]  ;;  %v70_v11 = vld [vmem:[#allocation5 + $0x48] sm:$0xff]  ;;  %s440_s13 = scalar_lea.vmem %s257_s12, 128  ;;  %p445_p2 = scmp.lt.s32.totalorder %s257_s12, %s257_s12 }
  0x29   :  { %304 = vmatprep.subr.mxu0 %v471_v0  ;;  %339 = vmatprep.subr.mxu1 %v471_v0  ;;  %v166_v12 = vld [vmem:[#allocation7 + $0x58] sm:$0xff]  ;;  %v69_v13 = vld [vmem:[#allocation5 + $0x40] sm:$0xff]  ;;  %v165_v14 = vld [vmem:[#allocation7 + $0x50] sm:$0xff]  ;;  %p441_p1 = scmp.ne.s32.totalorder %s257_s12, %s440_s13  ;;  %p446_p3 = scmp.lt.s32.totalorder %s440_s13, %s440_s13 }
  0x2a   :  { %305 = vmatpush3.msra.mxu0 %v75_v2  ;;  %340 = vmatpush3.msra.mxu1 %v169_v7  ;;  %v68_v15 = vld [vmem:[#allocation5 + $0x38] sm:$0xff]  ;;  %v164_v16 = vld [vmem:[#allocation7 + $0x48] sm:$0xff]  ;;  %v67_v17 = vld [vmem:[#allocation5 + $0x30] sm:$0xff] }
  0x2b   :  { %306 = vmatprep.subr.mxu0 %v471_v0  ;;  %341 = vmatprep.subr.mxu1 %v471_v0  ;;  %v163_v18 = vld [vmem:[#allocation7 + $0x40] sm:$0xff]  ;;  %v66_v19 = vld [vmem:[#allocation5 + $0x28] sm:$0xff]  ;;  %v162_v20 = vld [vmem:[#allocation7 + $0x38] sm:$0xff]  ;;  %p447_p4 = por %p446_p3, %p445_p2 }
  0x2c   :  { %307 = vmatpush3.msra.mxu0 %v74_v3  ;;  %342 = vmatpush3.msra.mxu1 %v168_v8  ;;  %v65_v21 = vld [vmem:[#allocation5 + $0x20] sm:$0xff]  ;;  %v161_v22 = vld [vmem:[#allocation7 + $0x30] sm:$0xff]  ;;  %v64_v23 = vld [vmem:[#allocation5 + $0x18] sm:$0xff] }
  0x2d   :  { %308 = vmatprep.subr.mxu0 %v471_v0  ;;  %343 = vmatprep.subr.mxu1 %v471_v0  ;;  %v160_v24 = vld [vmem:[#allocation7 + $0x28] sm:$0xff]  ;;  %v63_v25 = vld [vmem:[#allocation5 + $0x10] sm:$0xff]  ;;  %v159_v26 = vld [vmem:[#allocation7 + $0x20] sm:$0xff]  ;;  %p448_p5 = pnand %p447_p4, %p441_p1 }
  0x2e   :  { %309 = vmatpush3.msra.mxu0 %v73_v4  ;;  %344 = vmatpush3.msra.mxu1 %v167_v10  ;;  %v62_v27 = vld [vmem:[#allocation5 + $0x8] sm:$0xff]  ;;  %v158_v28 = vld [vmem:[#allocation7 + $0x18] sm:$0xff]  ;;  %v61_v29 = vld [vmem:[#allocation5] sm:$0xff] }
  0x2f   :  { %310 = vmatprep.subr.mxu0 %v471_v0  ;;  %345 = vmatprep.subr.mxu1 %v471_v0  ;;  %v60_v30 = vld [vmem:[#allocation2] sm:$0xff]  ;;  %v157_v31 = vld [vmem:[#allocation7 + $0x10] sm:$0xff]  ;;  %v156_v32 = vld [vmem:[#allocation7 + $0x8] sm:$0xff] }
  0x30   :  { %311 = vmatpush3.msra.mxu0 %v72_v6  ;;  %346 = vmatpush3.msra.mxu1 %v166_v12  ;;  %v155_v33 = vld [vmem:[#allocation7] sm:$0xff]  ;;  %v266_v34 = vld [vmem:[%s558_s2] ss:$0 sm:$0xff] }
  0x31   :  { %312 = vmatprep.subr.mxu0 %v471_v0  ;;  %347 = vmatprep.subr.mxu1 %v471_v0  ;;  %v267_v39 = vld [vmem:[%s560_s4] ss:$0 sm:$0xff] }
  0x32   :  { %313 = vmatpush3.msra.mxu0 %v71_v9  ;;  %348 = vmatpush3.msra.mxu1 %v165_v14 }
  0x33   :  { %314 = vmatprep.subr.mxu0 %v471_v0  ;;  %349 = vmatprep.subr.mxu1 %v471_v0 }
  0x34   :  { %315 = vmatpush3.msra.mxu0 %v70_v11  ;;  %350 = vmatpush3.msra.mxu1 %v164_v16 }
  0x35   :  { %316 = vmatprep.subr.mxu0 %v471_v0  ;;  %351 = vmatprep.subr.mxu1 %v471_v0 }
  0x36   :  { %317 = vmatpush3.msra.mxu0 %v69_v13  ;;  %352 = vmatpush3.msra.mxu1 %v163_v18 }
  0x37   :  { %318 = vmatprep.subr.mxu0 %v471_v0  ;;  %353 = vmatprep.subr.mxu1 %v471_v0 }
  0x38   :  { %319 = vmatpush3.msra.mxu0 %v68_v15  ;;  %354 = vmatpush3.msra.mxu1 %v162_v20 }
  0x39   :  { %320 = vmatprep.subr.mxu0 %v471_v0  ;;  %355 = vmatprep.subr.mxu1 %v471_v0 }
  0x3a   :  { %321 = vmatpush3.msra.mxu0 %v67_v17  ;;  %356 = vmatpush3.msra.mxu1 %v161_v22 }
  0x3b   :  { %322 = vmatprep.subr.mxu0 %v471_v0  ;;  %357 = vmatprep.subr.mxu1 %v471_v0 }
  0x3c   :  { %323 = vmatpush3.msra.mxu0 %v66_v19  ;;  %358 = vmatpush3.msra.mxu1 %v160_v24 }
  0x3d   :  { %324 = vmatprep.subr.mxu0 %v471_v0  ;;  %359 = vmatprep.subr.mxu1 %v471_v0 }
  0x3e   :  { %325 = vmatpush3.msra.mxu0 %v65_v21  ;;  %360 = vmatpush3.msra.mxu1 %v159_v26 }
  0x3f   :  { %326 = vmatprep.subr.mxu0 %v471_v0  ;;  %361 = vmatprep.subr.mxu1 %v471_v0 }
  0x40   :  { %327 = vmatpush3.msra.mxu0 %v64_v23  ;;  %362 = vmatpush3.msra.mxu1 %v158_v28 }
  0x41   :  { %328 = vmatprep.subr.mxu0 %v471_v0  ;;  %363 = vmatprep.subr.mxu1 %v471_v0 }
  0x42   :  { %329 = vmatpush3.msra.mxu0 %v63_v25  ;;  %364 = vmatpush3.msra.mxu1 %v157_v31 }
  0x43   :  { %330 = vmatprep.subr.mxu0 %v471_v0  ;;  %365 = vmatprep.subr.mxu1 %v471_v0 }
  0x44   :  { %331 = vmatpush3.msra.mxu0 %v62_v27  ;;  %366 = vmatpush3.msra.mxu1 %v156_v32 }
  0x45   :  { %332 = vmatprep.subr.mxu0 %v471_v0  ;;  %367 = vmatprep.subr.mxu1 %v471_v0 }
  0x46   :  { %333 = vmatpush3.msra.mxu0 %v61_v29  ;;  %368 = vmatpush3.msra.mxu1 %v155_v33 }
  0x47   :  { %335 = vmatmul.mubr.f32.vlgmr.msra.gmra.mxu0 %v60_v30 }
 0x107   :  { %v150_v35 = vpop.f32.mrf.mxu0 }
 0x108   :  { %v151_v36 = vadd.f32 %v266_v34, %v150_v35 }
 0x109   :  { %v336_v37 = vpop.f32.mrf.mxu0 }
 0x10a   :  { %v154_v38 = vmax.f32 %v151_v36, 0.0 }
 0x10c   :  { %370 = vmatmul.mubr.f32.vlgmr.msra.gmra.mxu1 %v154_v38 }
 0x1cc   :  { %v244_v40 = vpop.f32.mrf.mxu1 }
 0x1cd   :  { %v245_v41 = vadd.f32 %v267_v39, %v244_v40 }
 0x1ce   :  { %v371_v42 = vpop.f32.mrf.mxu1 }
 0x1cf   :  { %v248_v43 = vmax.f32 %v245_v41, 0.0 }
 0x1d1   :  { %249 = vst [vmem:[#allocation8] sm:$0xff] %v248_v43 }
 0x1d2   :  { %451 = shalt.err (!%p448_p5)
}
 0x1d3   :  { %259 = dma.vmem_to_hbm [thread:$0]  %s257_s12, 128, %s561_s5, [#allocation4]  }
 0x1d4   :  { %464 = dma.done.wait [#allocation4], 128  }
 0x1d5   :  { %465 = vsyncadd [#allocation4], 4294967168 }
 0x1d6   :  { %263 = vsyncpa [#allocation3], 1 }
 0x1d7   :  { %264 = vsyncpa [#allocation6], 1 }
 0x1d8   :  { %265 = vsyncpa [#allocation4], 1 }

</bundles_post_ra>
